<compile_context>
chip_gen: v6e
topology: v6e:2x2x1
jax: 0.10.0
libtpu: 0.0.40
codegen_flags: <defaults>
</compile_context>

<pallas_src>
import functools

import jax
import jax.numpy as jnp
from jax.experimental import pallas as pl
from jax.experimental.pallas import tpu as pltpu


# --------------------------------------------------------------------------
# Kernels
# --------------------------------------------------------------------------
def _rmsnorm_kernel(x_ref, w_ref, o_ref, *, eps):
    # x_ref: (tile_rows, H)   w_ref: (1, H)   o_ref: (tile_rows, H)
    x = x_ref[...].astype(jnp.float32)
    var = jnp.mean(x * x, axis=-1, keepdims=True)      # f32, matches torch
    inv = jax.lax.rsqrt(var + eps)
    o_ref[...] = (w_ref[...].astype(jnp.float32) * (x * inv)).astype(o_ref.dtype)


def _add_rmsnorm_kernel(x_ref, r_ref, w_ref, o_ref, h_ref, *, eps):
    # Fused GLMBlock pattern:  h = residual + x ;  o = rmsnorm(h) ;  emit both.
    h = x_ref[...] + r_ref[...]          # add in the input dtype (torch semantics)
    h_ref[...] = h
    hf = h.astype(jnp.float32)
    var = jnp.mean(hf * hf, axis=-1, keepdims=True)
    inv = jax.lax.rsqrt(var + eps)
    o_ref[...] = (w_ref[...].astype(jnp.float32) * (hf * inv)).astype(o_ref.dtype)


# --------------------------------------------------------------------------
# Hardware-aware tile selection
# --------------------------------------------------------------------------
def _round_up(x, m):
    return ((x + m - 1) // m) * m


def _round_down(x, m):
    return (x // m) * m


def _tpu_info():
    """(vmem_capacity_bytes, num_tensorcores) with conservative fallbacks."""
    vmem = 64 * 1024 * 1024   # v7x per-TC VMEM -- the smallest of the fleet
    cores = 1                 # single-TC fallback => never force extra splits
    try:
        info = pltpu.get_tpu_info()
        cap = int(getattr(info, "vmem_capacity_bytes", 0) or 0)
        if cap > 0:
            vmem = cap
        for attr in ("num_cores", "tensorcore_count", "num_tensorcores",
                     "core_count", "cores_per_chip"):
            v = getattr(info, attr, None)
            if v:
                cores = int(v)
                break
    except Exception:
        pass
    return vmem, cores


def _pick_tile_rows(rows, hidden, itemsize, num_row_streams):
    """Row tile: big enough to hide the ~0.35 us/step overhead, small enough
    that the double-buffered row-tiled arrays stay under ~half of VMEM, and
    (only on multi-TC chips) split into >= 2 full blocks per core."""
    sublane = 16 if itemsize == 2 else (32 if itemsize == 1 else 8)
    if rows <= sublane:
        return rows                       # full-dim block is always legal

    vmem_cap, num_cores = _tpu_info()
    total_budget = max(16 << 20, vmem_cap // 2)            # ~32 MiB on v7x
    per_block_budget = total_budget // (2 * num_row_streams)  # double-buffered
    budget_rows = max(sublane, per_block_budget // max(1, hidden * itemsize))

    tile = max(sublane, _round_down(budget_rows, sublane))
    tile = min(tile, _round_up(rows, sublane))

    if num_cores >= 2:
        # >= 2 blocks per TensorCore so each core pipelines and load balances.
        want_blocks = 2 * num_cores
        if pl.cdiv(rows, tile) < want_blocks:
            balanced = _round_up(pl.cdiv(rows, want_blocks), sublane)
            tile = max(sublane, min(tile, balanced))
    return tile


# --------------------------------------------------------------------------
# pallas_call builder shared by the plain and fused variants
# --------------------------------------------------------------------------
def _norm_call(x2d, w2d, eps, r2d=None, tile_rows=None):
    rows, hidden = x2d.shape
    dtype = x2d.dtype
    itemsize = jnp.dtype(dtype).itemsize
    fused = r2d is not None
    n_row_streams = 4 if fused else 2     # row-tiled arrays (inputs + outputs)

    if tile_rows is None:
        tile_rows = _pick_tile_rows(rows, hidden, itemsize, n_row_streams)

    grid = (pl.cdiv(rows, tile_rows),)    # ragged tail handled by Pallas masking

    row_spec = pl.BlockSpec((tile_rows, hidden), lambda i: (i, 0))
    # Weight stays resident (constant index map -> no re-DMA); cast in-kernel.
    w_spec = pl.BlockSpec((1, hidden), lambda i: (0, 0))

    block_bytes = tile_rows * hidden * itemsize
    w_bytes = hidden * jnp.dtype(w2d.dtype).itemsize
    vmem_cap, _ = _tpu_info()
    vmem_limit = int(min(
        vmem_cap,
        max(16 << 20, 2 * n_row_streams * block_bytes + 4 * w_bytes + (4 << 20))))

    cost = pl.CostEstimate(
        flops=(5 if fused else 4) * rows * hidden,
        transcendentals=rows,
        bytes_accessed=n_row_streams * rows * hidden * itemsize + w_bytes)

    compiler_params = pltpu.CompilerParams(
        dimension_semantics=("parallel",),
        vmem_limit_bytes=vmem_limit)

    if fused:
        return pl.pallas_call(
            functools.partial(_add_rmsnorm_kernel, eps=eps),
            out_shape=(jax.ShapeDtypeStruct((rows, hidden), dtype),   # rmsnorm(h)
                       jax.ShapeDtypeStruct((rows, hidden), dtype)),  # h = x + r
            grid_spec=pl.GridSpec(
                grid=grid,
                in_specs=[row_spec, row_spec, w_spec],
                out_specs=(row_spec, row_spec)),
            compiler_params=compiler_params,
            cost_estimate=cost,
        )(x2d, r2d, w2d)

    return pl.pallas_call(
        functools.partial(_rmsnorm_kernel, eps=eps),
        out_shape=jax.ShapeDtypeStruct((rows, hidden), dtype),
        grid_spec=pl.GridSpec(
            grid=grid,
            in_specs=[row_spec, w_spec],
            out_specs=row_spec),
        compiler_params=compiler_params,
        cost_estimate=cost,
    )(x2d, w2d)


# --------------------------------------------------------------------------
# Public wrappers (reshape glue only, no data movement)
# --------------------------------------------------------------------------
def rmsnorm(hidden_states: jax.Array, weight: jax.Array, eps: float = 1e-5,
            *, tile_rows: int | None = None) -> jax.Array:
    """RMSNorm over the last axis, scaled by `weight` (GLM RMSNorm.forward).
    `eps` must come from ChatGLMConfig.layernorm_epsilon."""
    orig_shape = hidden_states.shape
    hidden = orig_shape[-1]
    assert weight.shape == (hidden,)
    x2d = hidden_states.reshape(-1, hidden)
    out2d = _norm_call(x2d, weight.reshape(1, hidden), eps, tile_rows=tile_rows)
    return out2d.reshape(orig_shape)


def add_rmsnorm(hidden_states: jax.Array, residual: jax.Array,
                weight: jax.Array, eps: float = 1e-5,
                *, tile_rows: int | None = None):
    """Fused GLMBlock residual pattern: h = residual + hidden_states;
    returns (rmsnorm(h), h).  `h` feeds the next residual connection."""
    orig_shape = hidden_states.shape
    hidden = orig_shape[-1]
    assert weight.shape == (hidden,)
    assert residual.shape == orig_shape and residual.dtype == hidden_states.dtype
    x2d = hidden_states.reshape(-1, hidden)
    r2d = residual.reshape(-1, hidden)
    normed2d, h2d = _norm_call(x2d, weight.reshape(1, hidden), eps,
                               r2d=r2d, tile_rows=tile_rows)
    return normed2d.reshape(orig_shape), h2d.reshape(orig_shape)


# --------------------------------------------------------------------------
# Pure-JAX references (mirror the PyTorch forward)
# --------------------------------------------------------------------------
def rmsnorm_reference(hidden_states, weight, eps=1e-5):
    input_dtype = hidden_states.dtype
    x = hidden_states.astype(jnp.float32)
    variance = jnp.mean(x * x, axis=-1, keepdims=True)
    hs = x * jax.lax.rsqrt(variance + eps)
    return (weight.astype(jnp.float32) * hs).astype(input_dtype)


def add_rmsnorm_reference(hidden_states, residual, weight, eps=1e-5):
    h = hidden_states + residual
    return rmsnorm_reference(h, weight, eps), h


# --------------------------------------------------------------------------
# Self-test
# --------------------------------------------------------------------------
if __name__ == "__main__":
    key = jax.random.PRNGKey(0)
    eps = 1e-5   # ChatGLMConfig.layernorm_epsilon default

    # Plain RMSNorm: module-shaped toy, ragged tail, bf16, forced multi-block.
    cases = [
        ((2, 8, 32), jnp.float32, None),
        ((3, 50, 256), jnp.float32, None),   # rows=150 -> ragged last block
        ((2, 13, 128), jnp.bfloat16, None),  # bf16 -> 16-row sublane multiples
        ((4, 64, 128), jnp.float32, 64),     # explicit tile -> 4-block pipeline
    ]
    for i, (shape, dtype, tr) in enumerate(cases):
        k_x, k_w = jax.random.split(jax.random.fold_in(key, i))
        hidden = shape[-1]
        x = jax.random.normal(k_x, shape, dtype=jnp.float32).astype(dtype)
        w = (1.0 + 0.01 * jax.random.normal(k_w, (hidden,),
                                            dtype=jnp.float32)).astype(dtype)
        out = jax.block_until_ready(rmsnorm(x, w, eps=eps, tile_rows=tr))
        ref = rmsnorm_reference(x, w, eps=eps)
        assert out.shape == x.shape and out.dtype == x.dtype
        tol = 1e-5 if dtype == jnp.float32 else 2e-2
        assert jnp.allclose(out.astype(jnp.float32), ref.astype(jnp.float32),
                            atol=tol, rtol=tol), f"rmsnorm mismatch, case {i}"

    # Fused residual-add + RMSNorm (GLMBlock pattern).
    fused_cases = [
        ((2, 8, 32), jnp.float32),
        ((3, 50, 256), jnp.float32),
        ((2, 13, 128), jnp.bfloat16),
    ]
    for i, (shape, dtype) in enumerate(fused_cases):
        k_x, k_r, k_w = jax.random.split(jax.random.fold_in(key, 100 + i), 3)
        hidden = shape[-1]
        x = jax.random.normal(k_x, shape, dtype=jnp.float32).astype(dtype)
        r = jax.random.normal(k_r, shape, dtype=jnp.float32).astype(dtype)
        w = (1.0 + 0.01 * jax.random.normal(k_w, (hidden,),
                                            dtype=jnp.float32)).astype(dtype)
        normed, h = jax.block_until_ready(add_rmsnorm(x, r, w, eps=eps))
        ref_n, ref_h = add_rmsnorm_reference(x, r, w, eps=eps)
        assert normed.shape == x.shape and normed.dtype == x.dtype
        assert h.shape == x.shape and h.dtype == x.dtype
        tol = 1e-5 if dtype == jnp.float32 else 2e-2
        assert jnp.allclose(h.astype(jnp.float32), ref_h.astype(jnp.float32),
                            atol=tol, rtol=tol), f"fused residual mismatch, case {i}"
        assert jnp.allclose(normed.astype(jnp.float32), ref_n.astype(jnp.float32),
                            atol=tol, rtol=tol), f"fused norm mismatch, case {i}"

    print("KERNEL_OK")
</pallas_src>

<mosaic_0001>
module attributes {stable_mosaic.version = 11 : i64} {
  func.func @_rmsnorm_kernel(%arg0: i32, %arg1: memref<16x32xf32, #tpu.memory_space<vmem>>, %arg2: memref<1x32xf32, #tpu.memory_space<vmem>>, %arg3: memref<16x32xf32, #tpu.memory_space<vmem>>) attributes {dimension_semantics = [#tpu.dimension_semantics<parallel>], iteration_bounds = array<i64: 1>, scalar_prefetch = 0 : i64, scratch_operands = 0 : i64, tpu.core_type = #tpu.core_type<tc>, window_params = [{transform_indices = @transform_0, window_bounds = array<i64: 16, 32>}, {pipeline_mode = #tpu.pipeline_mode<synchronous>, transform_indices = @transform_1, window_bounds = array<i64: 1, 32>}, {transform_indices = @transform_2, window_bounds = array<i64: 16, 32>}]} {
    %c0 = arith.constant 0 : index
    %c0_0 = arith.constant 0 : index
    %0 = vector.load %arg1[%c0, %c0_0] : memref<16x32xf32, #tpu.memory_space<vmem>>, vector<16x32xf32>
    %1 = arith.mulf %0, %0 : vector<16x32xf32>
    %cst = arith.constant dense<0.000000e+00> : vector<16xf32>
    %2 = vector.multi_reduction <add>, %1, %cst [1] : vector<16x32xf32> to vector<16xf32>
    %3 = vector.shape_cast %2 : vector<16xf32> to vector<16x1xf32>
    %cst_1 = arith.constant 3.200000e+01 : f32
    %4 = vector.broadcast %cst_1 : f32 to vector<16x1xf32>
    %5 = arith.divf %3, %4 : vector<16x1xf32>
    %cst_2 = arith.constant 9.99999974E-6 : f32
    %6 = vector.broadcast %cst_2 : f32 to vector<16x1xf32>
    %7 = arith.addf %5, %6 : vector<16x1xf32>
    %8 = math.rsqrt %7 : vector<16x1xf32>
    %c0_3 = arith.constant 0 : index
    %c0_4 = arith.constant 0 : index
    %9 = vector.load %arg2[%c0_3, %c0_4] : memref<1x32xf32, #tpu.memory_space<vmem>>, vector<1x32xf32>
    %10 = vector.broadcast %8 : vector<16x1xf32> to vector<16x32xf32>
    %11 = arith.mulf %0, %10 : vector<16x32xf32>
    %12 = vector.broadcast %9 : vector<1x32xf32> to vector<16x32xf32>
    %13 = arith.mulf %12, %11 : vector<16x32xf32>
    %c0_5 = arith.constant 0 : index
    %c0_6 = arith.constant 0 : index
    %14 = vector.load %arg3[%c0_5, %c0_6] : memref<16x32xf32, #tpu.memory_space<vmem>>, vector<16x32xf32>
    tpu.vector_store %arg3[%c0_5, %c0_6], %13 {strides = array<i32>} : memref<16x32xf32, #tpu.memory_space<vmem>>, vector<16x32xf32>,
    return
  }
  func.func @transform_0(%arg0: i32) -> (i32, i32) {
    %c0_i32 = arith.constant 0 : i32
    %c0_i32_0 = arith.constant 0 : i32
    return %arg0, %c0_i32 : i32, i32
  }
  func.func @transform_1(%arg0: i32) -> (i32, i32) {
    %c0_i32 = arith.constant 0 : i32
    %c0_i32_0 = arith.constant 0 : i32
    %c0_i32_1 = arith.constant 0 : i32
    return %c0_i32, %c0_i32_0 : i32, i32
  }
  func.func @transform_2(%arg0: i32) -> (i32, i32) {
    %c0_i32 = arith.constant 0 : i32
    %c0_i32_0 = arith.constant 0 : i32
    return %arg0, %c0_i32 : i32, i32
  }
}

</mosaic_0001>

<bundles_post_ra>
// kernel: tpu_custom_call.1
= control target key start
LH: loop header
LB: loop body
LE: loop exit
PB: predicated region body
PF: predicated region fallthrough
CT: control target
= control target key end

     0   :  { %7 = vsyncpa [#allocation3], 0  ;;  %s165_s0 = inlined_call_operand.hbm [shape: f32[16,32], index: 0, kind: input, shape index: {}]   ;;  %s166_s1 = inlined_call_operand.vmem [shape: f32[1,32], index: 1, kind: input, shape index: {}]   ;;  %s167_s2 = inlined_call_operand.hbm [shape: f32[16,32], index: 2, kind: output, shape index: {}]  }
   0x1   :  { %8 = vsyncpa [#allocation4], 0  ;;  %s127_s9 = smov [#allocation2]  }
   0x2   :  { %s14_s10 = sshll.u32 %s127_s9, 4  ;;  %s15_s10 = int_to_ptr.vmem [resolvable:$true] %s14_s10 }
   0x3   :  { %s91_s11 = scalar_lea.vmem %s15_s10, 256  ;;  %p96_p1 = scmp.lt.s32.totalorder %s15_s10, %s15_s10 }
   0x4   :  { %p92_p0 = scmp.ne.s32.totalorder %s15_s10, %s91_s11  ;;  %p97_p2 = scmp.lt.s32.totalorder %s91_s11, %s91_s11 }
   0x6   :  { %p98_p3 = por %p97_p2, %p96_p1 }
   0x8   :  { %p99_p4 = pnand %p98_p3, %p92_p0 }
   0xa   :  { %102 = shalt.err (!%p99_p4)
}
   0xb   :  { %s128_s12 = smov 128   ;;  %s129_s13 = smov 8  }
   0xc   :  { %20 = dma.hbm_to_vmem [thread:$0]  %s165_s0, 256, %s15_s10, [#allocation3], %s128_s12, %s128_s12, %s129_s13  }
   0xd   :  { %123 = dma.done.wait [#allocation3], 256  }
   0xe   :  { %124 = vsyncadd [#allocation3], 4294967040  ;;  %v26_v0 = vld [vmem:[#allocation2] sm:$0xff]  ;;  %vm30_vm0 = vcmask 261120   ;;  %v27_v1 = vld [vmem:[#allocation2 + $0x8] sm:$0xff]  ;;  %s130_s17 = smov [#allocation5]  }
   0xf   :  { %v28_v2 = vmul.f32 %v26_v0, %v26_v0  ;;  %v29_v3 = vmul.f32 %v27_v1, %v27_v1  ;;  %v74_v13 = vld [vmem:[%s166_s1] ss:$0 sm:$0xff]  ;;  %s62_s18 = sshll.u32 %s130_s17, 4  ;;  %s63_s18 = int_to_ptr.vmem [resolvable:$true] %s62_s18 }
  0x10   :  { %s103_s19 = scalar_lea.vmem %s63_s18, 256  ;;  %p108_p6 = scmp.lt.s32.totalorder %s63_s18, %s63_s18 }
  0x11   :  { %v31_v4 = vsel %vm30_vm0, %v28_v2, 0.0  ;;  %v34_v5 = vsel %vm30_vm0, %v29_v3, 0.0  ;;  %p104_p5 = scmp.ne.s32.totalorder %s63_s18, %s103_s19  ;;  %p109_p7 = scmp.lt.s32.totalorder %s103_s19, %s103_s19 }
  0x12   :  { %32 = vadd.xlane.f32.xlu0 %v31_v4 }
  0x13   :  { %p110_p8 = por %p109_p7, %p108_p6 }
  0x15   :  { %p111_p9 = pnand %p110_p8, %p104_p5 }
  0x16   :  { %35 = vadd.xlane.f32.xlu0 %v34_v5 }
  0x9b   :  { %v33_v6 = vpop.xlane.xlu0 %32 }
  0x9c   :  { %v38_v7 = vmul.f32 0.03125, %v33_v6 }
  0x9e   :  { %v40_v8 = vadd.f32 1e-05, %v38_v7 }
  0x9f   :  { %v36_v9 = vpop.xlane.xlu0 %35 }
  0xa0   :  { %79 = vrsqrt.f32 %v40_v8  ;;  %v39_v10 = vmul.f32 0.03125, %v36_v9 }
  0xa2   :  { %v41_v11 = vadd.f32 1e-05, %v39_v10 }
  0xa4   :  { %81 = vrsqrt.f32 %v41_v11 }
  0xad   :  { %v80_v12 = vpop.eup %79 }
  0xae   :  { %v45_v14 = vmul.f32 %v80_v12, %v26_v0 }
  0xb0   :  { %v53_v15 = vmul.f32 %v74_v13, %v45_v14 }
  0xb1   :  { %v82_v16 = vpop.eup %81 }
  0xb2   :  { %v46_v17 = vmul.f32 %v82_v16, %v27_v1  ;;  %55 = vst.msk [vmem:[#allocation5] sm:$0xff] %vm30_vm0, %v53_v15 }
  0xb4   :  { %v54_v18 = vmul.f32 %v74_v13, %v46_v17 }
  0xb6   :  { %56 = vst.msk [vmem:[#allocation5 + $0x8] sm:$0xff] %vm30_vm0, %v54_v18 }
  0xb7   :  { %114 = shalt.err (!%p111_p9)
}
  0xb8   :  { %68 = dma.vmem_to_hbm [thread:$0]  %s63_s18, 256, %s167_s2, [#allocation4], %s128_s12, %s128_s12, %s129_s13  }
  0xb9   :  { %125 = dma.done.wait [#allocation4], 256  }
  0xba   :  { %126 = vsyncadd [#allocation4], 4294967040 }
  0xbb   :  { %72 = vsyncpa [#allocation3], 1 }
  0xbc   :  { %73 = vsyncpa [#allocation4], 1 }

</bundles_post_ra>
